<compile_context>
chip_gen: v5e
topology: v5e:2x2
jax: 0.10.0
libtpu: 0.0.40
codegen_flags: <defaults>
</compile_context>

<pallas_src>
import functools

import jax
import jax.numpy as jnp
from jax.experimental import pallas as pl
from jax.experimental.pallas import tpu as pltpu


def _round_up(n: int, m: int) -> int:
    return (n + m - 1) // m * m


def value_net_kernel(x_ref, w1t_ref, b1_ref, w2_ref, b2_ref, o_ref):
    # fc1 on the MXU: (tb, S) @ (S, H) -> (tb, H), f32 accumulation.
    h = jnp.dot(x_ref[...], w1t_ref[...], preferred_element_type=jnp.float32)
    h = jnp.maximum(h + b1_ref[...], 0.0)             # bias broadcast + ReLU on VPU
    # fc2 as VPU multiply + XLU lane reduction -> (tb, 1) column.
    v = jnp.sum(h * w2_ref[...], axis=1, keepdims=True) + b2_ref[0, 0]
    o_ref[...] = v.astype(o_ref.dtype)


@functools.partial(
    jax.jit, static_argnames=("target_tile_bytes", "bf16_matmul_min_dim")
)
def value_net_forward(
    x, w1, b1, w2, b2, *, target_tile_bytes: int = 4 << 20, bf16_matmul_min_dim: int = 128
):
    """PPO value head forward.

    x:  (B, S) float32            (same input layout as the PyTorch module)
    w1: (H, S), b1: (H,)          (PyTorch fc1.weight / fc1.bias layout)
    w2: (1, H) or (H,), b2: (1,)  (PyTorch fc2.weight / fc2.bias layout)
    returns (B, 1) float32
    """
    B, S = x.shape
    H = w1.shape[0]

    # bf16 gate for the fc1 matmul operands (halves HBM traffic on x when
    # mem-bound); accumulation stays f32 via preferred_element_type.
    use_bf16 = (S >= bf16_matmul_min_dim) and (H >= bf16_matmul_min_dim)
    in_dtype = jnp.bfloat16 if use_bf16 else jnp.float32
    itemsize = jnp.dtype(in_dtype).itemsize

    x_in = x.astype(in_dtype)                      # (B, S) native layout, no copy games
    w1_t = jnp.transpose(w1).astype(in_dtype)      # (S, H) -- tiny, stays VMEM-resident
    b1_row = b1.reshape(1, H).astype(jnp.float32)
    w2_row = w2.reshape(1, H).astype(jnp.float32)
    b2_s = b2.reshape(1, 1).astype(jnp.float32)

    # Auto-size the batch tile: ~target_tile_bytes of x per tile, multiple of 8
    # sublanes, O(2-16) grid steps instead of hundreds of 512-wide tiles.
    tb = max(8, (target_tile_bytes // max(1, S * itemsize)) // 8 * 8)
    if B >= 256:
        # Guarantee >= 2 grid steps so the "parallel" batch axis actually
        # shards across both TensorCores on v7x.
        tb = min(tb, _round_up(-(-B // 2), 8))
    tb = min(tb, _round_up(B, 8))
    grid = (pl.cdiv(B, tb),)

    # VMEM budget: double-buffered x tile + weights + output tiles (+ margin).
    x_tile_bytes = tb * S * itemsize
    w_bytes = S * H * itemsize + 2 * H * 4 + 4
    needed = 2 * x_tile_bytes + 2 * w_bytes + 2 * tb * 4 + (4 << 20)
    vmem_limit = int(min(60 << 20, max(needed, 16 << 20)))

    cost = pl.CostEstimate(
        flops=2 * B * S * H + 4 * B * H,
        transcendentals=0,
        bytes_accessed=B * S * itemsize + S * H * itemsize + (2 * H + 1) * 4 + B * 4,
    )

    out = pl.pallas_call(
        value_net_kernel,
        out_shape=jax.ShapeDtypeStruct((B, 1), jnp.float32),
        grid=grid,
        in_specs=[
            # Activations: a new (tb, S) batch tile per grid step, native layout.
            pl.BlockSpec((tb, S), lambda i: (i, 0)),
            # Weights/biases: constant block index -> VMEM-resident across steps.
            pl.BlockSpec((S, H), lambda i: (0, 0)),
            pl.BlockSpec((1, H), lambda i: (0, 0)),
            pl.BlockSpec((1, H), lambda i: (0, 0)),
            # fc2 bias as an SMEM scalar (no padded VMEM tile for one add).
            pl.BlockSpec((1, 1), lambda i: (0, 0), memory_space=pltpu.SMEM),
        ],
        out_specs=pl.BlockSpec((tb, 1), lambda i: (i, 0)),
        compiler_params=pltpu.CompilerParams(
            # Independent batch tiles -> shard across both TCs on v7x.
            dimension_semantics=("parallel",),
            vmem_limit_bytes=vmem_limit,
        ),
        cost_estimate=cost,
    )(x_in, w1_t, b1_row, w2_row, b2_s)

    return out


def init_params(key, state_dim, hidden_dim):
    """Deterministic init mimicking torch.nn.Linear defaults, PyTorch layouts."""
    k1, k2, k3, k4 = jax.random.split(key, 4)
    bound1 = 1.0 / jnp.sqrt(jnp.float32(state_dim))
    bound2 = 1.0 / jnp.sqrt(jnp.float32(hidden_dim))
    w1 = jax.random.uniform(k1, (hidden_dim, state_dim), jnp.float32, -bound1, bound1)
    b1 = jax.random.uniform(k2, (hidden_dim,), jnp.float32, -bound1, bound1)
    w2 = jax.random.uniform(k3, (1, hidden_dim), jnp.float32, -bound2, bound2)
    b2 = jax.random.uniform(k4, (1,), jnp.float32, -bound2, bound2)
    return w1, b1, w2, b2


if __name__ == "__main__":
    batch, state_dim, hidden_dim = 8, 16, 32

    key = jax.random.PRNGKey(0)
    kx, kp = jax.random.split(key)
    x = jax.random.normal(kx, (batch, state_dim), dtype=jnp.float32)
    w1, b1, w2, b2 = init_params(kp, state_dim, hidden_dim)

    out = value_net_forward(x, w1, b1, w2, b2)
    out = jax.block_until_ready(out)

    # Pure-JAX reference (PyTorch semantics: relu(x @ W1^T + b1) @ W2^T + b2).
    ref = jnp.maximum(x @ w1.T + b1, 0.0) @ w2.T + b2
    assert out.shape == (batch, 1)
    assert jnp.allclose(out, ref, atol=1e-5, rtol=1e-5)

    print("KERNEL_OK")
</pallas_src>

<mosaic_0001>
module attributes {stable_mosaic.version = 11 : i64} {
  func.func @value_net_kernel(%arg0: i32, %arg1: memref<8x16xf32, #tpu.memory_space<vmem>>, %arg2: memref<16x32xf32, #tpu.memory_space<vmem>>, %arg3: memref<1x32xf32, #tpu.memory_space<vmem>>, %arg4: memref<1x32xf32, #tpu.memory_space<vmem>>, %arg5: memref<1x1xf32, #tpu.memory_space<smem>>, %arg6: memref<8x1xf32, #tpu.memory_space<vmem>>) attributes {dimension_semantics = [#tpu.dimension_semantics<parallel>], iteration_bounds = array<i64: 1>, scalar_prefetch = 0 : i64, scratch_operands = 0 : i64, tpu.core_type = #tpu.core_type<tc>, window_params = [{transform_indices = @transform_0, window_bounds = array<i64: 8, 16>}, {pipeline_mode = #tpu.pipeline_mode<synchronous>, transform_indices = @transform_1, window_bounds = array<i64: 16, 32>}, {pipeline_mode = #tpu.pipeline_mode<synchronous>, transform_indices = @transform_2, window_bounds = array<i64: 1, 32>}, {pipeline_mode = #tpu.pipeline_mode<synchronous>, transform_indices = @transform_3, window_bounds = array<i64: 1, 32>}, {transform_indices = @transform_4, window_bounds = array<i64: 1, 1>}, {transform_indices = @transform_5, window_bounds = array<i64: 8, 1>}]} {
    %c0 = arith.constant 0 : index
    %c0_0 = arith.constant 0 : index
    %0 = vector.load %arg1[%c0, %c0_0] : memref<8x16xf32, #tpu.memory_space<vmem>>, vector<8x16xf32>
    %c0_1 = arith.constant 0 : index
    %c0_2 = arith.constant 0 : index
    %1 = vector.load %arg2[%c0_1, %c0_2] : memref<16x32xf32, #tpu.memory_space<vmem>>, vector<16x32xf32>
    %cst = arith.constant dense<0.000000e+00> : vector<8x32xf32>
    %2 = tpu.matmul %0, %1, %cst {dimension_numbers = #tpu.dot_dimension_numbers<[1], [0], [0], [1], [0, 0, 1, 1], [], []>} : vector<8x16xf32>, vector<16x32xf32>, vector<8x32xf32> -> vector<8x32xf32>
    %c0_3 = arith.constant 0 : index
    %c0_4 = arith.constant 0 : index
    %3 = vector.load %arg3[%c0_3, %c0_4] : memref<1x32xf32, #tpu.memory_space<vmem>>, vector<1x32xf32>
    %4 = vector.broadcast %3 : vector<1x32xf32> to vector<8x32xf32>
    %5 = arith.addf %2, %4 : vector<8x32xf32>
    %cst_5 = arith.constant 0.000000e+00 : f32
    %6 = vector.broadcast %cst_5 : f32 to vector<8x32xf32>
    %7 = arith.maximumf %5, %6 : vector<8x32xf32>
    %c0_6 = arith.constant 0 : index
    %c0_7 = arith.constant 0 : index
    %8 = vector.load %arg4[%c0_6, %c0_7] : memref<1x32xf32, #tpu.memory_space<vmem>>, vector<1x32xf32>
    %9 = vector.broadcast %8 : vector<1x32xf32> to vector<8x32xf32>
    %10 = arith.mulf %7, %9 : vector<8x32xf32>
    %cst_8 = arith.constant dense<0.000000e+00> : vector<8xf32>
    %11 = vector.multi_reduction <add>, %10, %cst_8 [1] : vector<8x32xf32> to vector<8xf32>
    %12 = vector.shape_cast %11 : vector<8xf32> to vector<8x1xf32>
    %c0_9 = arith.constant 0 : index
    %c0_10 = arith.constant 0 : index
    %13 = memref.load %arg5[%c0_9, %c0_10] : memref<1x1xf32, #tpu.memory_space<smem>>
    %14 = vector.broadcast %13 : f32 to vector<8x1xf32>
    %15 = arith.addf %12, %14 : vector<8x1xf32>
    %c0_11 = arith.constant 0 : index
    %c0_12 = arith.constant 0 : index
    %16 = vector.load %arg6[%c0_11, %c0_12] : memref<8x1xf32, #tpu.memory_space<vmem>>, vector<8x1xf32>
    tpu.vector_store %arg6[%c0_11, %c0_12], %15 {strides = array<i32>} : memref<8x1xf32, #tpu.memory_space<vmem>>, vector<8x1xf32>,
    return
  }
  func.func @transform_0(%arg0: i32) -> (i32, i32) {
    %c0_i32 = arith.constant 0 : i32
    %c0_i32_0 = arith.constant 0 : i32
    return %arg0, %c0_i32 : i32, i32
  }
  func.func @transform_1(%arg0: i32) -> (i32, i32) {
    %c0_i32 = arith.constant 0 : i32
    %c0_i32_0 = arith.constant 0 : i32
    %c0_i32_1 = arith.constant 0 : i32
    return %c0_i32, %c0_i32_0 : i32, i32
  }
  func.func @transform_2(%arg0: i32) -> (i32, i32) {
    %c0_i32 = arith.constant 0 : i32
    %c0_i32_0 = arith.constant 0 : i32
    %c0_i32_1 = arith.constant 0 : i32
    return %c0_i32, %c0_i32_0 : i32, i32
  }
  func.func @transform_3(%arg0: i32) -> (i32, i32) {
    %c0_i32 = arith.constant 0 : i32
    %c0_i32_0 = arith.constant 0 : i32
    %c0_i32_1 = arith.constant 0 : i32
    return %c0_i32, %c0_i32_0 : i32, i32
  }
  func.func @transform_4(%arg0: i32) -> (i32, i32) {
    %c0_i32 = arith.constant 0 : i32
    %c0_i32_0 = arith.constant 0 : i32
    %c0_i32_1 = arith.constant 0 : i32
    return %c0_i32, %c0_i32_0 : i32, i32
  }
  func.func @transform_5(%arg0: i32) -> (i32, i32) {
    %c0_i32 = arith.constant 0 : i32
    %c0_i32_0 = arith.constant 0 : i32
    return %arg0, %c0_i32 : i32, i32
  }
}

</mosaic_0001>

<bundles_post_ra>
// kernel: value_net_forward.1
= control target key start
LH: loop header
LB: loop body
LE: loop exit
PB: predicated region body
PF: predicated region fallthrough
CT: control target
= control target key end

     0   :  { %11 = vsyncpa [#allocation4], 0  ;;  %s214_s0 = inlined_call_operand.hbm [shape: f32[8,16], index: 0, kind: input, shape index: {}]   ;;  %s215_s1 = inlined_call_operand.hbm [shape: f32[16,32], index: 1, kind: input, shape index: {}]   ;;  %s216_s2 = inlined_call_operand.vmem [shape: f32[1,32], index: 2, kind: input, shape index: {}]   ;;  %s217_s3 = inlined_call_operand.vmem [shape: f32[1,32], index: 3, kind: input, shape index: {}]   ;;  %s218_s4 = inlined_call_operand.<no memory space> [shape: f32[1,1], index: 4, kind: input, shape index: {}]   ;;  %s219_s5 = inlined_call_operand.vmem [shape: f32[8,1], index: 5, kind: output, shape index: {}]  }
   0x1   :  { %s18_s20 = sshll.u32 %s214_s0, 4  ;;  %s19_s20 = int_to_ptr.hbm [resolvable:$true] %s18_s20 }
   0x2   :  { %12 = vsyncpa [#allocation6], 0  ;;  %s162_s21 = smov [#allocation3]   ;;  %s28_s25 = sshll.u32 %s215_s1, 4  ;;  %s29_s25 = int_to_ptr.hbm [resolvable:$true] %s28_s25 }
   0x3   :  { %s20_s22 = sshll.u32 %s162_s21, 4  ;;  %s163_s26 = smov [#allocation5]   ;;  %s21_s22 = int_to_ptr.vmem [resolvable:$true] %s20_s22 }
   0x4   :  { %23 = dma.hbm_to_vmem [thread:$0]  %s19_s20, 128, %s21_s22, [#allocation4]  }
   0x5   :  { %s30_s27 = sshll.u32 %s163_s26, 4  ;;  %s164_s28 = smov 128   ;;  %s31_s27 = int_to_ptr.vmem [resolvable:$true] %s30_s27 }
   0x6   :  { %s165_s29 = smov 8  }
   0x7   :  { %36 = dma.hbm_to_vmem [thread:$0]  %s29_s25, 256, %s31_s27, [#allocation6], %s164_s28, %s164_s28, %s165_s29  }
   0x8   :  { %158 = dma.done.wait [#allocation4], 128  }
   0x9   :  { %159 = vsyncadd [#allocation4], 4294967168 }
   0xa   :  { %160 = dma.done.wait [#allocation6], 256  }
   0xb   :  { %161 = vsyncadd [#allocation6], 4294967040  ;;  %v53_v0 = vld [vmem:[#allocation5 + $0x8] sm:$0xff]  ;;  %v52_v1 = vld [vmem:[#allocation5] sm:$0xff]  ;;  %vm58_vm0 = vcmask 130048   ;;  %vm88_vm1 = vcmask 261120   ;;  %v93_v10 = vstv %s218_s4 }
   0xc   :  { %76 = vmatpush.msra.mxu0 %v53_v0  ;;  %v51_v2 = vld [vmem:[#allocation3] sm:$0xff]  ;;  %vm95_vm2 = vcmask 7168  }
   0xd   :  { %v108_v3 = vld [vmem:[%s216_s2] ss:$0 sm:$0xff] }
   0xe   :  { %77 = vmatpush.msra.mxu0 %v52_v1  ;;  %v109_v6 = vld [vmem:[%s217_s3] ss:$0 sm:$0xff] }
   0xf   :  { %103 = vmatmul.msk.f32.vlgmr.msra.gmra.mxu0 %vm58_vm0, %v51_v2 }
  0x8c   :  { %v79_v4 = vpop.f32.mrf.mxu0 }
  0x8d   :  { %v80_v5 = vadd.f32 %v108_v3, %v79_v4 }
  0x8f   :  { %v82_v7 = vmax.f32 %v80_v5, 0.0 }
  0x91   :  { %v87_v8 = vmul.f32 %v109_v6, %v82_v7 }
  0x93   :  { %v89_v9 = vsel %vm88_vm1, %v87_v8, 0.0 }
  0x94   :  { %90 = vadd.xlane.f32.xlu0 %v89_v9 }
 0x107   :  { %v91_v11 = vpop.xlane.xlu0 %90 }
 0x108   :  { %v94_v12 = vadd.f32 %v93_v10, %v91_v11 }
 0x10a   :  { %96 = vst.msk [vmem:[%s219_s5] sm:$0xff] %vm95_vm2, %v94_v12 }
 0x10b   :  { %101 = vsyncpa [#allocation4], 1 }
 0x10c   :  { %102 = vsyncpa [#allocation6], 1 }

</bundles_post_ra>
